<compile_context>
chip_gen: v5e
topology: v5e:2x2
jax: 0.10.0
libtpu: 0.0.40
codegen_flags: <defaults>
</compile_context>

<pallas_src>
import functools

import jax
import jax.numpy as jnp
from jax.experimental import pallas as pl
from jax.experimental.pallas import tpu as pltpu


def groupnet_kernel(xT_ref,
                    w1_ref, b1_ref,
                    w2_ref, b2_ref,
                    w3_ref, b3_ref,
                    w4_ref, b4_ref,
                    outT_ref):
    """Fused feature-major MLP forward on one batch tile.

    xT_ref:   [F, TILE_B]            bf16  (batch on the lane axis)
    wN_ref:   [fout, fin]            bf16  (PyTorch nn.Linear layout)
    bN_ref:   [fout, 1]              f32
    outT_ref: [num_diseases, TILE_B] f32

    Matmuls run on the MXU with bf16 operands and f32 accumulation; bias-add,
    ReLU and sigmoid stay in f32.  Dropout (p=0.3) is identity in eval mode.
    """
    xT = xT_ref[...]                                          # bf16 [F, TILE_B]

    # fc1 -> relu
    h = jnp.dot(w1_ref[...], xT, preferred_element_type=jnp.float32)
    h = jnp.maximum(h + b1_ref[...], 0.0).astype(jnp.bfloat16)
    # TODO(synk): training-mode dropout (p=0.3) omitted; eval-mode is identity.

    # fc2 -> relu
    h = jnp.dot(w2_ref[...], h, preferred_element_type=jnp.float32)
    h = jnp.maximum(h + b2_ref[...], 0.0).astype(jnp.bfloat16)

    # fc3 -> relu
    h = jnp.dot(w3_ref[...], h, preferred_element_type=jnp.float32)
    h = jnp.maximum(h + b3_ref[...], 0.0).astype(jnp.bfloat16)

    # output -> sigmoid
    logits = jnp.dot(w4_ref[...], h, preferred_element_type=jnp.float32)
    logits = logits + b4_ref[...]
    outT_ref[...] = jax.nn.sigmoid(logits).astype(outT_ref.dtype)


def _cdiv(a, b):
    return (a + b - 1) // b


def _round_up(a, m):
    return _cdiv(a, m) * m


def _choose_tiling(B, max_tile_b):
    """Pick (TILE_B, B_pad).

    Small B: one full-array batch block (no padding, single grid step).
    Large B: lane-aligned tile (multiple of 128), capped at max_tile_b, with
    an even grid length >= 2 so v7x can split the "parallel" axis over its
    two TensorCores.
    """
    if B < 256:
        return B, B
    n = max(2, _cdiv(B, max_tile_b))
    if n % 2:
        n += 1
    tile = _round_up(_cdiv(B, n), 128)
    n = _cdiv(B, tile)
    if n % 2:            # rounding re-broke parity: pad one extra (dummy) step
        n += 1
    return tile, n * tile


@functools.partial(jax.jit, static_argnames=("max_tile_b",))
def groupnet_forward(x, params, *, max_tile_b=4096):
    """x: [B, input_size] f32; params: wN [out,in] (PyTorch layout), bN [out]."""
    B, F = x.shape
    nd = params["w4"].shape[0]

    TILE_B, B_pad = _choose_tiling(B, max_tile_b)
    n_steps = B_pad // TILE_B

    # One fused XLA op: feature-major transpose + bf16 cast + lane-axis pad.
    xT = jnp.pad(x.T.astype(jnp.bfloat16), ((0, 0), (0, B_pad - B)))

    w1 = params["w1"].astype(jnp.bfloat16)
    w2 = params["w2"].astype(jnp.bfloat16)
    w3 = params["w3"].astype(jnp.bfloat16)
    w4 = params["w4"].astype(jnp.bfloat16)
    b1 = params["b1"].astype(jnp.float32).reshape(-1, 1)
    b2 = params["b2"].astype(jnp.float32).reshape(-1, 1)
    b3 = params["b3"].astype(jnp.float32).reshape(-1, 1)
    b4 = params["b4"].astype(jnp.float32).reshape(-1, 1)

    def resident(arr):
        # Full-array block, same block index every grid step -> VMEM-resident.
        return pl.BlockSpec(arr.shape, lambda i: (0, 0))

    in_specs = [
        pl.BlockSpec((F, TILE_B), lambda i: (0, i)),      # streamed x^T tile
        resident(w1), resident(b1),
        resident(w2), resident(b2),
        resident(w3), resident(b3),
        resident(w4), resident(b4),
    ]
    out_spec = pl.BlockSpec((nd, TILE_B), lambda i: (0, i))

    flops = 2 * B_pad * (F * 64 + 64 * 32 + 32 * 16 + 16 * nd)
    bytes_accessed = (
        F * B_pad * 2                                   # x^T (bf16)
        + nd * B_pad * 4                                # output (f32)
        + (F * 64 + 64 * 32 + 32 * 16 + 16 * nd) * 2    # weights (bf16)
        + (64 + 32 + 16 + nd) * 4                       # biases (f32)
    )
    cost = pl.CostEstimate(flops=flops,
                           transcendentals=B_pad * nd,   # sigmoid
                           bytes_accessed=bytes_accessed)

    outT = pl.pallas_call(
        groupnet_kernel,
        out_shape=jax.ShapeDtypeStruct((nd, B_pad), jnp.float32),
        grid=(n_steps,),
        in_specs=in_specs,
        out_specs=out_spec,
        compiler_params=pltpu.CompilerParams(
            dimension_semantics=("parallel",),
            vmem_limit_bytes=32 * 1024 * 1024),
        cost_estimate=cost,
    )(xT, w1, b1, w2, b2, w3, b3, w4, b4)

    # Back to batch-major, drop padded rows (layout plumbing in the wrapper).
    return outT[:, :B].T


def init_params(key, input_size, num_diseases):
    """PyTorch-style init: weights [out_features, in_features], uniform +/- 1/sqrt(fan_in)."""
    dims = [(input_size, 64), (64, 32), (32, 16), (16, num_diseases)]
    params = {}
    for i, (fin, fout) in enumerate(dims, start=1):
        key, kw, kb = jax.random.split(key, 3)
        bound = 1.0 / (fin ** 0.5)
        params[f"w{i}"] = jax.random.uniform(
            kw, (fout, fin), jnp.float32, minval=-bound, maxval=bound)
        params[f"b{i}"] = jax.random.uniform(
            kb, (fout,), jnp.float32, minval=-bound, maxval=bound)
    return params


def groupnet_reference_bf16(x, params):
    """Plain-JAX reference mirroring the kernel's bf16 operand rounding."""
    bf, f32 = jnp.bfloat16, jnp.float32

    def r(a):  # bf16-round operands, accumulate in f32 (matches MXU path)
        return a.astype(bf).astype(f32)

    h = jnp.maximum(r(x) @ r(params["w1"]).T + params["b1"], 0.0)
    h = jnp.maximum(r(h) @ r(params["w2"]).T + params["b2"], 0.0)
    h = jnp.maximum(r(h) @ r(params["w3"]).T + params["b3"], 0.0)
    return jax.nn.sigmoid(r(h) @ r(params["w4"]).T + params["b4"])


def groupnet_reference_f32(x, params):
    """Pure f32 reference (loose check against bf16 quantization error)."""
    h = jnp.maximum(x @ params["w1"].T + params["b1"], 0.0)
    h = jnp.maximum(h @ params["w2"].T + params["b2"], 0.0)
    h = jnp.maximum(h @ params["w3"].T + params["b3"], 0.0)
    return jax.nn.sigmoid(h @ params["w4"].T + params["b4"])


if __name__ == "__main__":
    key = jax.random.PRNGKey(0)
    batch, input_size, num_diseases = 8, 32, 5

    key, kx = jax.random.split(key)
    x = jax.random.normal(kx, (batch, input_size), jnp.float32)
    params = init_params(key, input_size, num_diseases)

    # Small-batch path: single grid step, full-array batch block.
    out = jax.block_until_ready(groupnet_forward(x, params))
    assert out.shape == (batch, num_diseases)
    assert jnp.allclose(out, groupnet_reference_bf16(x, params),
                        atol=1e-4, rtol=1e-3)
    assert jnp.allclose(out, groupnet_reference_f32(x, params),
                        atol=3e-2, rtol=3e-2)

    # Larger batch: exercises the multi-step even grid (2 x 512) + tail padding.
    key, kx2 = jax.random.split(key)
    x_big = jax.random.normal(kx2, (1000, input_size), jnp.float32)
    out_big = jax.block_until_ready(groupnet_forward(x_big, params))
    assert out_big.shape == (1000, num_diseases)
    assert jnp.allclose(out_big, groupnet_reference_bf16(x_big, params),
                        atol=1e-4, rtol=1e-3)

    print("KERNEL_OK")
</pallas_src>

<mosaic_0001>
module attributes {stable_mosaic.version = 11 : i64} {
  func.func @groupnet_kernel(%arg0: i32, %arg1: memref<32x8xbf16, #tpu.memory_space<vmem>>, %arg2: memref<64x32xbf16, #tpu.memory_space<vmem>>, %arg3: memref<64x1xf32, #tpu.memory_space<vmem>>, %arg4: memref<32x64xbf16, #tpu.memory_space<vmem>>, %arg5: memref<32x1xf32, #tpu.memory_space<vmem>>, %arg6: memref<16x32xbf16, #tpu.memory_space<vmem>>, %arg7: memref<16x1xf32, #tpu.memory_space<vmem>>, %arg8: memref<5x16xbf16, #tpu.memory_space<vmem>>, %arg9: memref<5x1xf32, #tpu.memory_space<vmem>>, %arg10: memref<5x8xf32, #tpu.memory_space<vmem>>) attributes {dimension_semantics = [#tpu.dimension_semantics<parallel>], iteration_bounds = array<i64: 1>, scalar_prefetch = 0 : i64, scratch_operands = 0 : i64, tpu.core_type = #tpu.core_type<tc>, window_params = [{transform_indices = @transform_0, window_bounds = array<i64: 32, 8>}, {pipeline_mode = #tpu.pipeline_mode<synchronous>, transform_indices = @transform_1, window_bounds = array<i64: 64, 32>}, {pipeline_mode = #tpu.pipeline_mode<synchronous>, transform_indices = @transform_2, window_bounds = array<i64: 64, 1>}, {pipeline_mode = #tpu.pipeline_mode<synchronous>, transform_indices = @transform_3, window_bounds = array<i64: 32, 64>}, {pipeline_mode = #tpu.pipeline_mode<synchronous>, transform_indices = @transform_4, window_bounds = array<i64: 32, 1>}, {pipeline_mode = #tpu.pipeline_mode<synchronous>, transform_indices = @transform_5, window_bounds = array<i64: 16, 32>}, {pipeline_mode = #tpu.pipeline_mode<synchronous>, transform_indices = @transform_6, window_bounds = array<i64: 16, 1>}, {pipeline_mode = #tpu.pipeline_mode<synchronous>, transform_indices = @transform_7, window_bounds = array<i64: 5, 16>}, {pipeline_mode = #tpu.pipeline_mode<synchronous>, transform_indices = @transform_8, window_bounds = array<i64: 5, 1>}, {transform_indices = @transform_9, window_bounds = array<i64: 5, 8>}]} {
    %c0 = arith.constant 0 : index
    %c0_0 = arith.constant 0 : index
    %0 = vector.load %arg1[%c0, %c0_0] : memref<32x8xbf16, #tpu.memory_space<vmem>>, vector<32x8xbf16>
    %c0_1 = arith.constant 0 : index
    %c0_2 = arith.constant 0 : index
    %1 = vector.load %arg2[%c0_1, %c0_2] : memref<64x32xbf16, #tpu.memory_space<vmem>>, vector<64x32xbf16>
    %cst = arith.constant dense<0.000000e+00> : vector<64x8xf32>
    %2 = tpu.matmul %1, %0, %cst {dimension_numbers = #tpu.dot_dimension_numbers<[1], [0], [0], [1], [0, 0, 1, 1], [], []>} : vector<64x32xbf16>, vector<32x8xbf16>, vector<64x8xf32> -> vector<64x8xf32>
    %c0_3 = arith.constant 0 : index
    %c0_4 = arith.constant 0 : index
    %3 = vector.load %arg3[%c0_3, %c0_4] : memref<64x1xf32, #tpu.memory_space<vmem>>, vector<64x1xf32>
    %4 = vector.broadcast %3 : vector<64x1xf32> to vector<64x8xf32>
    %5 = arith.addf %2, %4 : vector<64x8xf32>
    %cst_5 = arith.constant 0.000000e+00 : f32
    %6 = vector.broadcast %cst_5 : f32 to vector<64x8xf32>
    %7 = arith.maximumf %5, %6 : vector<64x8xf32>
    %8 = arith.truncf %7 : vector<64x8xf32> to vector<64x8xbf16>
    %c0_6 = arith.constant 0 : index
    %c0_7 = arith.constant 0 : index
    %9 = vector.load %arg4[%c0_6, %c0_7] : memref<32x64xbf16, #tpu.memory_space<vmem>>, vector<32x64xbf16>
    %cst_8 = arith.constant dense<0.000000e+00> : vector<32x8xf32>
    %10 = tpu.matmul %9, %8, %cst_8 {dimension_numbers = #tpu.dot_dimension_numbers<[1], [0], [0], [1], [0, 0, 1, 1], [], []>} : vector<32x64xbf16>, vector<64x8xbf16>, vector<32x8xf32> -> vector<32x8xf32>
    %c0_9 = arith.constant 0 : index
    %c0_10 = arith.constant 0 : index
    %11 = vector.load %arg5[%c0_9, %c0_10] : memref<32x1xf32, #tpu.memory_space<vmem>>, vector<32x1xf32>
    %12 = vector.broadcast %11 : vector<32x1xf32> to vector<32x8xf32>
    %13 = arith.addf %10, %12 : vector<32x8xf32>
    %cst_11 = arith.constant 0.000000e+00 : f32
    %14 = vector.broadcast %cst_11 : f32 to vector<32x8xf32>
    %15 = arith.maximumf %13, %14 : vector<32x8xf32>
    %16 = arith.truncf %15 : vector<32x8xf32> to vector<32x8xbf16>
    %c0_12 = arith.constant 0 : index
    %c0_13 = arith.constant 0 : index
    %17 = vector.load %arg6[%c0_12, %c0_13] : memref<16x32xbf16, #tpu.memory_space<vmem>>, vector<16x32xbf16>
    %cst_14 = arith.constant dense<0.000000e+00> : vector<16x8xf32>
    %18 = tpu.matmul %17, %16, %cst_14 {dimension_numbers = #tpu.dot_dimension_numbers<[1], [0], [0], [1], [0, 0, 1, 1], [], []>} : vector<16x32xbf16>, vector<32x8xbf16>, vector<16x8xf32> -> vector<16x8xf32>
    %c0_15 = arith.constant 0 : index
    %c0_16 = arith.constant 0 : index
    %19 = vector.load %arg7[%c0_15, %c0_16] : memref<16x1xf32, #tpu.memory_space<vmem>>, vector<16x1xf32>
    %20 = vector.broadcast %19 : vector<16x1xf32> to vector<16x8xf32>
    %21 = arith.addf %18, %20 : vector<16x8xf32>
    %cst_17 = arith.constant 0.000000e+00 : f32
    %22 = vector.broadcast %cst_17 : f32 to vector<16x8xf32>
    %23 = arith.maximumf %21, %22 : vector<16x8xf32>
    %24 = arith.truncf %23 : vector<16x8xf32> to vector<16x8xbf16>
    %c0_18 = arith.constant 0 : index
    %c0_19 = arith.constant 0 : index
    %25 = vector.load %arg8[%c0_18, %c0_19] : memref<5x16xbf16, #tpu.memory_space<vmem>>, vector<5x16xbf16>
    %cst_20 = arith.constant dense<0.000000e+00> : vector<5x8xf32>
    %26 = tpu.matmul %25, %24, %cst_20 {dimension_numbers = #tpu.dot_dimension_numbers<[1], [0], [0], [1], [0, 0, 1, 1], [], []>} : vector<5x16xbf16>, vector<16x8xbf16>, vector<5x8xf32> -> vector<5x8xf32>
    %c0_21 = arith.constant 0 : index
    %c0_22 = arith.constant 0 : index
    %27 = vector.load %arg9[%c0_21, %c0_22] : memref<5x1xf32, #tpu.memory_space<vmem>>, vector<5x1xf32>
    %28 = vector.broadcast %27 : vector<5x1xf32> to vector<5x8xf32>
    %29 = arith.addf %26, %28 : vector<5x8xf32>
    %30 = arith.negf %29 : vector<5x8xf32>
    %31 = math.exp %30 : vector<5x8xf32>
    %cst_23 = arith.constant 1.000000e+00 : f32
    %32 = vector.broadcast %cst_23 : f32 to vector<5x8xf32>
    %33 = arith.addf %32, %31 : vector<5x8xf32>
    %34 = arith.divf %32, %33 : vector<5x8xf32>
    %c0_24 = arith.constant 0 : index
    %c0_25 = arith.constant 0 : index
    %35 = vector.load %arg10[%c0_24, %c0_25] : memref<5x8xf32, #tpu.memory_space<vmem>>, vector<5x8xf32>
    tpu.vector_store %arg10[%c0_24, %c0_25], %34 {strides = array<i32>} : memref<5x8xf32, #tpu.memory_space<vmem>>, vector<5x8xf32>,
    return
  }
  func.func @transform_0(%arg0: i32) -> (i32, i32) {
    %c0_i32 = arith.constant 0 : i32
    %c0_i32_0 = arith.constant 0 : i32
    return %c0_i32, %arg0 : i32, i32
  }
  func.func @transform_1(%arg0: i32) -> (i32, i32) {
    %c0_i32 = arith.constant 0 : i32
    %c0_i32_0 = arith.constant 0 : i32
    %c0_i32_1 = arith.constant 0 : i32
    return %c0_i32, %c0_i32_0 : i32, i32
  }
  func.func @transform_2(%arg0: i32) -> (i32, i32) {
    %c0_i32 = arith.constant 0 : i32
    %c0_i32_0 = arith.constant 0 : i32
    %c0_i32_1 = arith.constant 0 : i32
    return %c0_i32, %c0_i32_0 : i32, i32
  }
  func.func @transform_3(%arg0: i32) -> (i32, i32) {
    %c0_i32 = arith.constant 0 : i32
    %c0_i32_0 = arith.constant 0 : i32
    %c0_i32_1 = arith.constant 0 : i32
    return %c0_i32, %c0_i32_0 : i32, i32
  }
  func.func @transform_4(%arg0: i32) -> (i32, i32) {
    %c0_i32 = arith.constant 0 : i32
    %c0_i32_0 = arith.constant 0 : i32
    %c0_i32_1 = arith.constant 0 : i32
    return %c0_i32, %c0_i32_0 : i32, i32
  }
  func.func @transform_5(%arg0: i32) -> (i32, i32) {
    %c0_i32 = arith.constant 0 : i32
    %c0_i32_0 = arith.constant 0 : i32
    %c0_i32_1 = arith.constant 0 : i32
    return %c0_i32, %c0_i32_0 : i32, i32
  }
  func.func @transform_6(%arg0: i32) -> (i32, i32) {
    %c0_i32 = arith.constant 0 : i32
    %c0_i32_0 = arith.constant 0 : i32
    %c0_i32_1 = arith.constant 0 : i32
    return %c0_i32, %c0_i32_0 : i32, i32
  }
  func.func @transform_7(%arg0: i32) -> (i32, i32) {
    %c0_i32 = arith.constant 0 : i32
    %c0_i32_0 = arith.constant 0 : i32
    %c0_i32_1 = arith.constant 0 : i32
    return %c0_i32, %c0_i32_0 : i32, i32
  }
  func.func @transform_8(%arg0: i32) -> (i32, i32) {
    %c0_i32 = arith.constant 0 : i32
    %c0_i32_0 = arith.constant 0 : i32
    %c0_i32_1 = arith.constant 0 : i32
    return %c0_i32, %c0_i32_0 : i32, i32
  }
  func.func @transform_9(%arg0: i32) -> (i32, i32) {
    %c0_i32 = arith.constant 0 : i32
    %c0_i32_0 = arith.constant 0 : i32
    return %c0_i32, %arg0 : i32, i32
  }
}

</mosaic_0001>

<bundles_post_ra>
// kernel: groupnet_forward.1
= control target key start
LH: loop header
LB: loop body
LE: loop exit
PB: predicated region body
PF: predicated region fallthrough
CT: control target
= control target key end

     0   :  { %v401_v1 = vmov 0   ;;  %vm125_vm0 = vcmask 261120   ;;  %vm217_vm1 = vcmask 523264   ;;  %vm295_vm2 = vcmask 130048   ;;  %s535_s0 = inlined_call_operand.vmem [shape: bf16[32,8], index: 0, kind: input, shape index: {}]   ;;  %s536_s2 = inlined_call_operand.vmem [shape: f32[64,1], index: 2, kind: input, shape index: {}]   ;;  %s537_s1 = inlined_call_operand.vmem [shape: bf16[64,32], index: 1, kind: input, shape index: {}]   ;;  %s538_s4 = inlined_call_operand.vmem [shape: f32[32,1], index: 4, kind: input, shape index: {}]   ;;  %s539_s6 = inlined_call_operand.vmem [shape: f32[16,1], index: 6, kind: input, shape index: {}]   ;;  %s540_s8 = inlined_call_operand.vmem [shape: f32[5,1], index: 8, kind: input, shape index: {}]   ;;  %s541_s3 = inlined_call_operand.vmem [shape: bf16[32,64], index: 3, kind: input, shape index: {}]   ;;  %s542_s5 = inlined_call_operand.vmem [shape: bf16[16,32], index: 5, kind: input, shape index: {}]   ;;  %s543_s7 = inlined_call_operand.vmem [shape: bf16[5,16], index: 7, kind: input, shape index: {}]   ;;  %s544_s9 = inlined_call_operand.vmem [shape: f32[5,8], index: 9, kind: output, shape index: {}]  }
   0x1   :  { %v383_v0 = vld [vmem:[%s535_s0 + $0x8] sm:$0xff]  ;;  %394 = vset.pattern.permute.xlu0 %v401_v1  ;;  %v51_v2 = vld [vmem:[%s536_s2 + $0x30] sm:$0xff]  ;;  %395 = vset.pattern.permute.xlu1 %v401_v1  ;;  %v49_v3 = vld [vmem:[%s536_s2 + $0x20] sm:$0xff]  ;;  %vm331_vm6 = vcmask 61440  }
   0x2   :  { %85 = vperm.xlu0 %394, %v51_v2   ;;  %396 = vset.pattern.permute.xlu2 %v401_v1  ;;  %v382_v4 = vld [vmem:[%s535_s0] sm:$0xff]  ;;  %v52_v6 = vld [vmem:[%s536_s2 + $0x38] sm:$0xff]  ;;  %v50_v8 = vld [vmem:[%s536_s2 + $0x28] sm:$0xff] }
   0x3   :  { %144 = vmatpush.bf16.msra.mxu0 %v383_v0  ;;  %75 = vperm.xlu1 %395, %v49_v3   ;;  %v384_v5 = vld [vmem:[%s537_s1] sm:$0xff]  ;;  %v387_v7 = vld [vmem:[%s537_s1 + $0x18] sm:$0xff]  ;;  %v47_v9 = vld [vmem:[%s536_s2 + $0x10] sm:$0xff] }
   0x4   :  { %391 = vmatpush.bf16.msra.mxu3 %v383_v0  ;;  %65 = vperm.xlu2 %396, %v47_v9   ;;  %v45_v10 = vld [vmem:[%s536_s2] sm:$0xff]  ;;  %v46_v11 = vld [vmem:[%s536_s2 + $0x8] sm:$0xff]  ;;  %v48_v12 = vld [vmem:[%s536_s2 + $0x18] sm:$0xff] }
   0x5   :  { %v385_v13 = vld [vmem:[%s537_s1 + $0x8] sm:$0xff]  ;;  %v186_v14 = vld [vmem:[%s538_s4 + $0x18] sm:$0xff]  ;;  %v183_v15 = vld [vmem:[%s538_s4] sm:$0xff] }
   0x6   :  { %v185_v16 = vld [vmem:[%s538_s4 + $0x10] sm:$0xff]  ;;  %v251_v17 = vld [vmem:[%s539_s6] sm:$0xff]  ;;  %v252_v18 = vld [vmem:[%s539_s6 + $0x8] sm:$0xff] }
   0x7   :  { %145 = vmatpush.bf16.msra.mxu0 %v382_v4  ;;  %v184_v19 = vld [vmem:[%s538_s4 + $0x8] sm:$0xff]  ;;  %v386_v20 = vld [vmem:[%s537_s1 + $0x10] sm:$0xff]  ;;  %v289_v21 = vld [vmem:[%s540_s8] sm:$0x1f] }
   0x8   :  { %392 = vmatpush.bf16.msra.mxu3 %v382_v4  ;;  %v388_v58 = vld [vmem:[%s541_s3] sm:$0xff]  ;;  %v389_v59 = vld [vmem:[%s541_s3 + $0x8] sm:$0xff] }
   0xa   :  { %361 = vmatmul.msk.bf16.vlgmr.msra.gmra.mxu0 %vm125_vm0, %v384_v5  ;;  %90 = vperm.xlu0 %394, %v52_v6  }
   0xb   :  { %80 = vperm.xlu1 %395, %v50_v8   ;;  %364 = vmatmul.msk.bf16.vlgmr.msra.gmra.mxu3 %vm125_vm0, %v387_v7 }
   0xc   :  { %70 = vperm.xlu2 %396, %v48_v12  }
  0x12   :  { %55 = vperm.xlu0 %394, %v45_v10  }
  0x13   :  { %60 = vperm.xlu1 %395, %v46_v11  }
  0x14   :  { %199 = vperm.xlu2 %396, %v185_v16  }
  0x1a   :  { %362 = vmatmul.msk.bf16.gmra.mxu0 %vm125_vm0, %v385_v13  ;;  %204 = vperm.xlu0 %394, %v186_v14   ;;  %v390_v14 = vld [vmem:[%s542_s5] sm:$0xff] }
  0x1b   :  { %189 = vperm.xlu1 %395, %v183_v15  }
  0x1c   :  { %194 = vperm.xlu2 %396, %v184_v19  }
  0x22   :  { %255 = vperm.xlu0 %394, %v251_v17  }
  0x23   :  { %260 = vperm.xlu1 %395, %v252_v18  }
  0x24   :  { %292 = vperm.xlu2 %396, %v289_v21  }
  0x2a   :  { %363 = vmatmul.msk.bf16.gmra.mxu0 %vm125_vm0, %v386_v20 }
  0x5e   :  { %v66_v36 = vpop.permute.xlu2 %65 }
  0x66   :  { %v71_v40 = vpop.permute.xlu2 %70 }
  0x6e   :  { %v200_v62 = vpop.permute.xlu2 %199 }
  0x74   :  { %v86_v23 = vpop.permute.xlu0 %85 }
  0x75   :  { %v76_v34 = vpop.permute.xlu1 %75 }
  0x76   :  { %v195_v0 = vpop.permute.xlu2 %194 }
  0x7c   :  { %v91_v27 = vpop.permute.xlu0 %90 }
  0x7d   :  { %v81_v37 = vpop.permute.xlu1 %80 }
  0x84   :  { %v56_v48 = vpop.permute.xlu0 %55 }
  0x85   :  { %v61_v44 = vpop.permute.xlu1 %60 }
  0x87   :  { %v147_v22 = vpop.f32.mrf.mxu0 }
  0x88   :  { %v148_v52 = vadd.f32 %v147_v22, %v56_v48 }
  0x8a   :  { %v167_v56 = vmax.f32 %v148_v52, 0.0 }
  0x8c   :  { %v205_v2 = vpop.permute.xlu0 %204 }
  0x8d   :  { %v190_v6 = vpop.permute.xlu1 %189 }
  0x8e   :  { %v162_v24 = vpop.f32.mrf.mxu3 }
  0x8f   :  { %v149_v25 = vpop.f32.mrf.mxu0  ;;  %v163_v26 = vadd.f32 %v162_v24, %v86_v23  ;;  %v288_v24 = vld [vmem:[%s543_s7] sm:$0x7] }
  0x90   :  { %v150_v49 = vadd.f32 %v149_v25, %v61_v44  ;;  %v293_v25 = vpop.permute.xlu2 %292 }
  0x91   :  { %v173_v30 = vmax.f32 %v163_v26, 0.0 }
  0x92   :  { %v168_v54 = vmax.f32 %v150_v49, 0.0 }
  0x94   :  { %v175_v57 = vpack.c.bf16 %v168_v54, %v167_v56  ;;  %v256_v16 = vpop.permute.xlu0 %255 }
  0x95   :  { %v261_v18 = vpop.permute.xlu1 %260 }
  0x96   :  { %v164_v28 = vpop.f32.mrf.mxu3 }
  0x97   :  { %v152_v29 = vpop.f32.mrf.mxu0  ;;  %v165_v31 = vadd.f32 %v164_v28, %v91_v27 }
  0x98   :  { %v153_v45 = vadd.f32 %v152_v29, %v66_v36 }
  0x99   :  { %v174_v32 = vmax.f32 %v165_v31, 0.0 }
  0x9a   :  { %v169_v53 = vmax.f32 %v153_v45, 0.0 }
  0x9b   :  { %v178_v33 = vpack.c.bf16 %v174_v32, %v173_v30 }
  0x9d   :  { %228 = vmatpush.bf16.msra.mxu1 %v178_v33 }
  0x9f   :  { %v154_v35 = vpop.f32.mrf.mxu0 }
  0xa0   :  { %v155_v42 = vadd.f32 %v154_v35, %v71_v40 }
  0xa2   :  { %v170_v50 = vmax.f32 %v155_v42, 0.0 }
  0xa4   :  { %v176_v55 = vpack.c.bf16 %v170_v50, %v169_v53 }
  0xa7   :  { %v157_v38 = vpop.f32.mrf.mxu0 }
  0xa8   :  { %v158_v39 = vadd.f32 %v157_v38, %v76_v34 }
  0xaa   :  { %v171_v46 = vmax.f32 %v158_v39, 0.0 }
  0xaf   :  { %v159_v41 = vpop.f32.mrf.mxu0 }
  0xb0   :  { %v160_v43 = vadd.f32 %v159_v41, %v81_v37 }
  0xb2   :  { %v172_v47 = vmax.f32 %v160_v43, 0.0 }
  0xb4   :  { %v177_v51 = vpack.c.bf16 %v172_v47, %v171_v46 }
  0xb6   :  { %229 = vmatpush.bf16.msra.mxu1 %v177_v51 }
  0xba   :  { %230 = vmatpush.bf16.msra.mxu1 %v176_v55 }
  0xbe   :  { %231 = vmatpush.bf16.msra.mxu1 %v175_v57 }
  0xc1   :  { %373 = vmatmul.msk.bf16.vlgmr.msra.gmra.mxu1 %vm217_vm1, %v388_v58 }
  0xd1   :  { %374 = vmatmul.msk.bf16.gmra.mxu1 %vm217_vm1, %v389_v59 }
 0x13e   :  { %v233_v60 = vpop.f32.mrf.mxu1 }
 0x13f   :  { %v234_v7 = vadd.f32 %v233_v60, %v190_v6 }
 0x141   :  { %v243_v12 = vmax.f32 %v234_v7, 0.0 }
 0x146   :  { %v235_v61 = vpop.f32.mrf.mxu1 }
 0x147   :  { %v236_v4 = vadd.f32 %v235_v61, %v195_v0 }
 0x149   :  { %v244_v10 = vmax.f32 %v236_v4, 0.0 }
 0x14b   :  { %v247_v13 = vpack.c.bf16 %v244_v10, %v243_v12 }
 0x14e   :  { %v238_v63 = vpop.f32.mrf.mxu1 }
 0x14f   :  { %v239_v1 = vadd.f32 %v238_v63, %v200_v62 }
 0x151   :  { %v245_v8 = vmax.f32 %v239_v1, 0.0 }
 0x156   :  { %v240_v3 = vpop.f32.mrf.mxu1 }
 0x157   :  { %v241_v5 = vadd.f32 %v240_v3, %v205_v2 }
 0x159   :  { %v246_v9 = vmax.f32 %v241_v5, 0.0 }
 0x15b   :  { %v248_v11 = vpack.c.bf16 %v246_v9, %v245_v8 }
 0x15d   :  { %277 = vmatpush.bf16.msra.mxu2 %v248_v11 }
 0x161   :  { %278 = vmatpush.bf16.msra.mxu2 %v247_v13 }
 0x164   :  { %379 = vmatmul.msk.bf16.vlgmr.msra.gmra.mxu2 %vm125_vm0, %v390_v14 }
 0x1e7   :  { %v280_v15 = vpop.f32.mrf.mxu2 }
 0x1e8   :  { %v281_v17 = vadd.f32 %v280_v15, %v256_v16 }
 0x1ea   :  { %v285_v21 = vmax.f32 %v281_v17, 0.0 }
 0x1ef   :  { %v282_v19 = vpop.f32.mrf.mxu2 }
 0x1f0   :  { %v283_v20 = vadd.f32 %v282_v19, %v261_v18 }
 0x1f2   :  { %v286_v22 = vmax.f32 %v283_v20, 0.0 }
 0x1f4   :  { %v287_v23 = vpack.c.bf16 %v286_v22, %v285_v21 }
 0x1f6   :  { %306 = vmatpush.bf16.msrb.mxu3 %v287_v23 }
 0x1f9   :  { %380 = vmatmul.msk.bf16.vlgmr.msrb.gmra.mxu3 %vm295_vm2, %v288_v24 }
 0x27c   :  { %v308_v26 = vpop.f32.mrf.mxu3 }
 0x27d   :  { %v309_v27 = vadd.f32 %v308_v26, %v293_v25 }
 0x27f   :  { %v381_v28 = vmul.f32 -1.442695, %v309_v27 }
 0x281   :  { %397 = vpow2.f32 %v381_v28 }
 0x284   :  { %v310_v29 = vpop.f32.mrf.mxu3 }
 0x287   :  { %v398_v30 = vpop.eup %397 }
 0x288   :  { %v315_v31 = vadd.f32 1.0, %v398_v30 }
 0x28a   :  { %399 = vrcp.f32 %v315_v31  ;;  %v327_v35 = vand.u32 2147483648, %v315_v31  ;;  %v325_v37 = vand.u32 2147483647, %v315_v31  ;;  %vm321_vm4 = vweird.f32 %v315_v31 }
 0x28c   :  { %v328_v39 = vor.u32 1.1754944e-38, %v327_v35  ;;  %vm326_vm7 = vcmp.eq.f32.partialorder %v325_v37, 8.507059e+37 }
 0x290   :  { %v400_v32 = vpop.eup %399 }
 0x291   :  { %v317_v33 = vmul.f32 %v400_v32, %v315_v31  ;;  %vm322_vm3 = vweird.f32 %v400_v32 }
 0x292   :  { %vm323_vm5 = vmor %vm321_vm4, %vm322_vm3 }
 0x293   :  { %v318_v34 = vsub.f32 1.0, %v317_v33 }
 0x295   :  { %v319_v36 = vmul.f32 %v400_v32, %v318_v34 }
 0x297   :  { %v320_v38 = vadd.f32 %v400_v32, %v319_v36 }
 0x299   :  { %v324_v40 = vsel %vm323_vm5, %v400_v32, %v320_v38 }
 0x29a   :  { %v329_v41 = vsel %vm326_vm7, %v328_v39, %v324_v40 }
 0x29b   :  { %332 = vst.msk [vmem:[%s544_s9] sm:$0x1f] %vm331_vm6, %v329_v41 }

</bundles_post_ra>
